<compile_context>
chip_gen: v7x
topology: tpu7x:2x2x1
jax: 0.10.0
libtpu: 0.0.40
codegen_flags: <defaults>
</compile_context>

<pallas_src>
import jax
import jax.numpy as jnp
from jax.experimental import pallas as pl
from jax.experimental.pallas import tpu as pltpu


def _round_up(a: int, b: int) -> int:
    return (a + b - 1) // b * b


# ----------------------------------------------------------------------------
# Kernels
# ----------------------------------------------------------------------------
def _fullk_kernel(x_ref, w_ref, b_ref, o_ref):
    """Single reduction step: whole K fits in one tile.  No accumulator."""
    acc = jax.lax.dot_general(
        x_ref[...], w_ref[...],
        dimension_numbers=(((1,), (1,)), ((), ())),   # contract In of both
        preferred_element_type=jnp.float32,
    )
    z = acc + b_ref[...]                               # f32 epilogue (v5e-safe)
    o_ref[...] = jax.nn.sigmoid(z).astype(o_ref.dtype)


def _tiledk_f32out_kernel(x_ref, w_ref, b_ref, o_ref):
    """K tiled, f32 output: accumulate directly in the resident o_ref block."""
    k = pl.program_id(2)

    @pl.when(k == 0)
    def _():
        o_ref[...] = jnp.zeros_like(o_ref)

    o_ref[...] += jax.lax.dot_general(
        x_ref[...], w_ref[...],
        dimension_numbers=(((1,), (1,)), ((), ())),
        preferred_element_type=jnp.float32,
    )

    @pl.when(k == pl.num_programs(2) - 1)
    def _():
        o_ref[...] = jax.nn.sigmoid(o_ref[...] + b_ref[...])


def _tiledk_scratch_kernel(x_ref, w_ref, b_ref, o_ref, acc_ref):
    """K tiled, non-f32 output: f32 VMEM accumulator, cast on the last step."""
    k = pl.program_id(2)

    @pl.when(k == 0)
    def _():
        acc_ref[...] = jnp.zeros_like(acc_ref)

    acc_ref[...] += jax.lax.dot_general(
        x_ref[...], w_ref[...],
        dimension_numbers=(((1,), (1,)), ((), ())),
        preferred_element_type=jnp.float32,
    )

    @pl.when(k == pl.num_programs(2) - 1)
    def _():
        z = acc_ref[...] + b_ref[...]
        o_ref[...] = jax.nn.sigmoid(z).astype(o_ref.dtype)


# ----------------------------------------------------------------------------
# Tile / VMEM sizing
# ----------------------------------------------------------------------------
def _vmem_limits():
    """(tile_budget_bytes, vmem_limit_bytes) derived from the chip generation."""
    try:
        phys = int(pltpu.get_tpu_info().vmem_capacity_bytes)
    except Exception:
        phys = 64 * 1024 * 1024          # conservative: v7x per-TC VMEM
    # Scoped limit we ask the compiler for (leave room for internal scratch).
    vmem_limit = max(32 * 1024 * 1024, min(phys - 16 * 1024 * 1024,
                                           96 * 1024 * 1024))
    # What we let the double-buffered tiles occupy (~30% headroom).
    tile_budget = min(int(vmem_limit * 0.7), 48 * 1024 * 1024)
    return tile_budget, int(vmem_limit)


def _choose_tiles(B, Out, In, op_itemsize, out_itemsize, sublane, budget):
    """Pick (tm, tn, tk).  Prefers full-K tiles; keeps tn MXU-wide (256)."""
    K_full = _round_up(In, 128)
    tm_full = _round_up(B, sublane)
    tn_full = _round_up(Out, 128)

    def fits(tm, tn, tk, with_acc):
        fp = 2 * (tm * tk * op_itemsize +            # x tile   (double-buffered)
                  tn * tk * op_itemsize +            # w tile   (double-buffered)
                  tn * 4 +                           # bias     (double-buffered)
                  tm * tn * out_itemsize)            # out tile (double-buffered)
        if with_acc:
            fp += tm * tn * 4                        # f32 accumulator (single)
        return fp <= budget

    for tm_cap, tn_cap in ((512, 512), (512, 256), (256, 256), (128, 256),
                           (64, 256), (32, 256), (16, 256),
                           (sublane, 256), (sublane, 128)):
        tm = min(tm_full, tm_cap)
        tn = min(tn_full, tn_cap)
        # Full-K tile: single reduction step, no accumulator.
        if K_full <= 8192 and fits(tm, tn, K_full, with_acc=False):
            return tm, tn, K_full
        # Otherwise the largest 256-multiple K tile that fits (with acc).
        for tk in (4096, 2048, 1024, 512, 256):
            tk_c = min(tk, K_full)
            if fits(tm, tn, tk_c, with_acc=True):
                return tm, tn, tk_c
    # Last resort: guaranteed-tiny tiles.
    return min(tm_full, sublane), min(tn_full, 128), min(K_full, 256)


# ----------------------------------------------------------------------------
# Wrapper
# ----------------------------------------------------------------------------
def sigmoid_layer(x, weight, bias, *, operand_dtype=None):
    """sigmoid(x @ weight.T + bias).

    x: (B, In); weight: (Out, In) (PyTorch layout); bias: (Out,).
    operand_dtype: optional matmul-operand dtype (e.g. jnp.bfloat16).  Cast is
    done once in the wrapper; ideally store the weight at rest in that dtype.
    Output dtype matches the original x dtype.
    """
    B, In = x.shape
    Out, In_w = weight.shape
    assert In == In_w and bias.shape == (Out,)

    out_dtype = x.dtype
    if operand_dtype is not None and jnp.dtype(operand_dtype) != x.dtype:
        x = x.astype(operand_dtype)
        weight = weight.astype(operand_dtype)

    op_itemsize = jnp.dtype(x.dtype).itemsize
    out_itemsize = jnp.dtype(out_dtype).itemsize
    sublane = 8 if (op_itemsize >= 4 and out_itemsize >= 4) else 16

    tile_budget, vmem_limit = _vmem_limits()
    tm, tn, tk = _choose_tiles(B, Out, In, op_itemsize, out_itemsize,
                               sublane, tile_budget)

    M_pad = _round_up(B, tm)
    N_pad = _round_up(Out, tn)
    K_pad = _round_up(In, tk)

    # Pad only when needed (aligned shapes emit no extra XLA op / HBM pass).
    # Zero padding contributes 0 to the dot; padded rows/cols are sliced off.
    if (M_pad, K_pad) != (B, In):
        x = jnp.pad(x, ((0, M_pad - B), (0, K_pad - In)))
    if (N_pad, K_pad) != (Out, In):
        # TODO(synk): for persistently-unaligned Out/In, pad the weight once at
        # model-load time instead of per call.
        weight = jnp.pad(weight, ((0, N_pad - Out), (0, K_pad - In)))
    b2 = bias.reshape(1, Out).astype(jnp.float32)
    if N_pad != Out:
        b2 = jnp.pad(b2, ((0, 0), (0, N_pad - Out)))

    gm, gn, gk = M_pad // tm, N_pad // tn, K_pad // tk

    cost = pl.CostEstimate(
        flops=2 * M_pad * N_pad * K_pad,
        transcendentals=M_pad * N_pad,
        bytes_accessed=(M_pad * K_pad + N_pad * K_pad) * op_itemsize
                       + N_pad * 4 + M_pad * N_pad * out_itemsize,
    )

    if gk == 1:
        out_p = pl.pallas_call(
            _fullk_kernel,
            out_shape=jax.ShapeDtypeStruct((M_pad, N_pad), out_dtype),
            grid_spec=pltpu.PrefetchScalarGridSpec(
                num_scalar_prefetch=0,
                grid=(gm, gn),
                in_specs=[
                    pl.BlockSpec((tm, K_pad), lambda i, j: (i, 0)),   # x
                    pl.BlockSpec((tn, K_pad), lambda i, j: (j, 0)),   # W (Out,In)
                    pl.BlockSpec((1, tn), lambda i, j: (0, j)),       # bias
                ],
                out_specs=pl.BlockSpec((tm, tn), lambda i, j: (i, j)),
            ),
            compiler_params=pltpu.CompilerParams(
                dimension_semantics=("parallel", "parallel"),
                vmem_limit_bytes=vmem_limit),
            cost_estimate=cost,
        )(x, weight, b2)
    else:
        f32_out = jnp.dtype(out_dtype) == jnp.dtype(jnp.float32)
        kernel = _tiledk_f32out_kernel if f32_out else _tiledk_scratch_kernel
        scratch = [] if f32_out else [pltpu.VMEM((tm, tn), jnp.float32)]
        out_p = pl.pallas_call(
            kernel,
            out_shape=jax.ShapeDtypeStruct((M_pad, N_pad), out_dtype),
            grid_spec=pltpu.PrefetchScalarGridSpec(
                num_scalar_prefetch=0,
                grid=(gm, gn, gk),
                in_specs=[
                    pl.BlockSpec((tm, tk), lambda i, j, k: (i, k)),   # x
                    pl.BlockSpec((tn, tk), lambda i, j, k: (j, k)),   # W (Out,In)
                    pl.BlockSpec((1, tn), lambda i, j, k: (0, j)),    # bias
                ],
                out_specs=pl.BlockSpec((tm, tn), lambda i, j, k: (i, j)),
                scratch_shapes=scratch,
            ),
            compiler_params=pltpu.CompilerParams(
                dimension_semantics=("parallel", "parallel", "arbitrary"),
                vmem_limit_bytes=vmem_limit),
            cost_estimate=cost,
        )(x, weight, b2)

    if (M_pad, N_pad) != (B, Out):
        out_p = out_p[:B, :Out]
    return out_p


if __name__ == "__main__":
    key = jax.random.PRNGKey(0)
    k_x, k_w, k_b = jax.random.split(key, 3)

    B, input_size, output_size = 8, 32, 16

    # Deterministic synthetic parameters (PyTorch-like uniform init range).
    bound = 1.0 / jnp.sqrt(input_size)
    weight = jax.random.uniform(k_w, (output_size, input_size),
                                dtype=jnp.float32, minval=-bound, maxval=bound)
    bias = jax.random.uniform(k_b, (output_size,),
                              dtype=jnp.float32, minval=-bound, maxval=bound)
    x = jax.random.normal(k_x, (B, input_size), dtype=jnp.float32)

    ref = jax.nn.sigmoid(x @ weight.T + bias)

    # Full-precision path.
    out = sigmoid_layer(x, weight, bias)
    jax.block_until_ready(out)
    assert out.shape == (B, output_size)
    assert jnp.allclose(out, ref, atol=1e-5, rtol=1e-5)

    # bf16-operand path (wrapper-side cast; f32 epilogue/output).
    out_bf16 = sigmoid_layer(x, weight, bias, operand_dtype=jnp.bfloat16)
    jax.block_until_ready(out_bf16)
    assert out_bf16.shape == (B, output_size)
    assert jnp.allclose(out_bf16, ref, atol=2e-2, rtol=2e-2)

    print("KERNEL_OK")
</pallas_src>

<mosaic_0001>
module attributes {stable_mosaic.version = 11 : i64} {
  func.func @_fullk_kernel(%arg0: i32, %arg1: i32, %arg2: memref<8x128xf32, #tpu.memory_space<vmem>>, %arg3: memref<128x128xf32, #tpu.memory_space<vmem>>, %arg4: memref<1x128xf32, #tpu.memory_space<vmem>>, %arg5: memref<8x128xf32, #tpu.memory_space<vmem>>) attributes {dimension_semantics = [#tpu.dimension_semantics<parallel>, #tpu.dimension_semantics<parallel>], iteration_bounds = array<i64: 1, 1>, scalar_prefetch = 0 : i64, scratch_operands = 0 : i64, tpu.core_type = #tpu.core_type<tc>, window_params = [{transform_indices = @transform_0, window_bounds = array<i64: 8, 128>}, {transform_indices = @transform_1, window_bounds = array<i64: 128, 128>}, {transform_indices = @transform_2, window_bounds = array<i64: 1, 128>}, {transform_indices = @transform_3, window_bounds = array<i64: 8, 128>}]} {
    %c0 = arith.constant 0 : index
    %c0_0 = arith.constant 0 : index
    %0 = vector.load %arg2[%c0, %c0_0] : memref<8x128xf32, #tpu.memory_space<vmem>>, vector<8x128xf32>
    %c0_1 = arith.constant 0 : index
    %c0_2 = arith.constant 0 : index
    %1 = vector.load %arg3[%c0_1, %c0_2] : memref<128x128xf32, #tpu.memory_space<vmem>>, vector<128x128xf32>
    %cst = arith.constant dense<0.000000e+00> : vector<8x128xf32>
    %2 = tpu.matmul %0, %1, %cst {dimension_numbers = #tpu.dot_dimension_numbers<[1], [1], [0], [0], [0, 0, 1, 0], [], []>} : vector<8x128xf32>, vector<128x128xf32>, vector<8x128xf32> -> vector<8x128xf32>
    %c0_3 = arith.constant 0 : index
    %c0_4 = arith.constant 0 : index
    %3 = vector.load %arg4[%c0_3, %c0_4] : memref<1x128xf32, #tpu.memory_space<vmem>>, vector<1x128xf32>
    %4 = vector.broadcast %3 : vector<1x128xf32> to vector<8x128xf32>
    %5 = arith.addf %2, %4 : vector<8x128xf32>
    %6 = arith.negf %5 : vector<8x128xf32>
    %7 = math.exp %6 : vector<8x128xf32>
    %cst_5 = arith.constant 1.000000e+00 : f32
    %8 = vector.broadcast %cst_5 : f32 to vector<8x128xf32>
    %9 = arith.addf %8, %7 : vector<8x128xf32>
    %10 = arith.divf %8, %9 : vector<8x128xf32>
    %c0_6 = arith.constant 0 : index
    %c0_7 = arith.constant 0 : index
    %11 = vector.load %arg5[%c0_6, %c0_7] : memref<8x128xf32, #tpu.memory_space<vmem>>, vector<8x128xf32>
    tpu.vector_store %arg5[%c0_6, %c0_7], %10 {strides = array<i32>} : memref<8x128xf32, #tpu.memory_space<vmem>>, vector<8x128xf32>,
    return
  }
  func.func @transform_0(%arg0: i32, %arg1: i32) -> (i32, i32) {
    %c0_i32 = arith.constant 0 : i32
    %c0_i32_0 = arith.constant 0 : i32
    return %arg0, %c0_i32 : i32, i32
  }
  func.func @transform_1(%arg0: i32, %arg1: i32) -> (i32, i32) {
    %c0_i32 = arith.constant 0 : i32
    %c0_i32_0 = arith.constant 0 : i32
    return %arg1, %c0_i32 : i32, i32
  }
  func.func @transform_2(%arg0: i32, %arg1: i32) -> (i32, i32) {
    %c0_i32 = arith.constant 0 : i32
    %c0_i32_0 = arith.constant 0 : i32
    return %c0_i32, %arg1 : i32, i32
  }
  func.func @transform_3(%arg0: i32, %arg1: i32) -> (i32, i32) {
    %c0_i32 = arith.constant 0 : i32
    return %arg0, %arg1 : i32, i32
  }
}

</mosaic_0001>

<bundles_post_ra>
// kernel: tpu_custom_call.1
= control target key start
LH: loop header
LB: loop body
LE: loop exit
PB: predicated region body
PF: predicated region fallthrough
CT: control target
= control target key end

     0   :  { %8 = vsyncpa [#allocation3], 0  ;;  %s394_s0 = inlined_call_operand.hbm [shape: f32[8,128], index: 0, kind: input, shape index: {}]   ;;  %s395_s1 = inlined_call_operand.hbm [shape: f32[128,128], index: 1, kind: input, shape index: {}]   ;;  %s396_s2 = inlined_call_operand.vmem [shape: f32[1,128], index: 2, kind: input, shape index: {}]   ;;  %s397_s3 = inlined_call_operand.hbm [shape: f32[8,128], index: 3, kind: output, shape index: {}]  }
   0x1   :  { %9 = vsyncpa [#allocation6], 0 }
   0x2   :  { %10 = vsyncpa [#allocation4], 0  ;;  %s320_s12 = smov [#allocation2]   ;;  %s321_s14 = smov [#allocation5]  }
   0x3   :  { %s17_s13 = sshll.u32 %s320_s12, 4  ;;  %s26_s15 = sshll.u32 %s321_s14, 4  ;;  %s18_s13 = int_to_ptr.vmem [resolvable:$true] %s17_s13  ;;  %s348_s15 = int_to_ptr.vmem [resolvable:$true] %s26_s15 }
   0x4   :  { %s248_s18 = scalar_lea.hbm %s394_s0, 128 }
   0x5   :  { %p249_p0 = scmp.ne.s32.totalorder %s394_s0, %s248_s18  ;;  %p252_p1 = scmp.lt.u32.totalorder %s248_s18, %s394_s0 }
   0x7   :  { %p254_p2 = pnand %p252_p1, %p249_p0 }
   0x9   :  { %257 = shalt.err (!%p254_p2)
}
   0xa   :  { %s258_s23 = scalar_lea.vmem %s18_s13, 128  ;;  %p263_p4 = scmp.lt.s32.totalorder %s18_s13, %s18_s13 }
   0xb   :  { %p259_p3 = scmp.ne.s32.totalorder %s18_s13, %s258_s23  ;;  %p264_p5 = scmp.lt.s32.totalorder %s258_s23, %s258_s23 }
   0xd   :  { %p265_p6 = por %p264_p5, %p263_p4 }
   0xf   :  { %p266_p7 = pnand %p265_p6, %p259_p3 }
  0x11   :  { %269 = shalt.err (!%p266_p7)
}
  0x12   :  { %20 = dma.hbm_to_vmem [thread:$0]  %s394_s0, 128, %s18_s13, [#allocation3]  }
  0x13   :  { %s270_s28 = scalar_lea.hbm %s395_s1, 2048 }
  0x14   :  { %p271_p8 = scmp.ne.s32.totalorder %s395_s1, %s270_s28  ;;  %p274_p9 = scmp.lt.u32.totalorder %s270_s28, %s395_s1 }
  0x16   :  { %p276_p10 = pnand %p274_p9, %p271_p8 }
  0x18   :  { %279 = shalt.err (!%p276_p10)
}
  0x19   :  { %s280_s6 = scalar_lea.vmem %s348_s15, 2048  ;;  %p285_p12 = scmp.lt.s32.totalorder %s348_s15, %s348_s15 }
  0x1a   :  { %p281_p11 = scmp.ne.s32.totalorder %s348_s15, %s280_s6  ;;  %p286_p13 = scmp.lt.s32.totalorder %s280_s6, %s280_s6 }
  0x1c   :  { %p287_p0 = por %p286_p13, %p285_p12 }
  0x1e   :  { %p288_p1 = pnand %p287_p0, %p281_p11 }
  0x20   :  { %291 = shalt.err (!%p288_p1)
}
  0x21   :  { %s322_s0 = smov 128   ;;  %s323_s7 = smov 8  }
  0x22   :  { %32 = dma.hbm_to_vmem [thread:$0]  %s395_s1, 2048, %s348_s15, [#allocation6], %s322_s0, %s322_s0, %s323_s7  }
  0x23   :  { %314 = dma.done.wait [#allocation3], 128  }
  0x24   :  { %315 = vsyncadd [#allocation3], 4294967168 }
  0x25   :  { %316 = dma.done.wait [#allocation6], 2048  }
  0x26   :  { %317 = vsyncadd [#allocation6], 4294965248  ;;  %v324_v0 = vmov 0.0|0.0   ;;  %vm325_vm0 = vmmov 0   ;;  %v326_v1 = vmov 0.0   ;;  %v42_v2 = vld [vmem:[#allocation5] sm:$0xff] }
  0x27   :  { %212 = vmatprep.subr.bf16.mxu0 %v324_v0  ;;  %209 = vmatprep.mubr.msk.f32.mxu0 %vm325_vm0, %v326_v1  ;;  %v43_v3 = vld [vmem:[#allocation5 + $0x8] sm:$0xff]  ;;  %v44_v5 = vld [vmem:[#allocation5 + $0x10] sm:$0xff]  ;;  %v45_v6 = vld [vmem:[#allocation5 + $0x18] sm:$0xff]  ;;  %s327_s11 = smov [#allocation7]  }
  0x28   :  { %v213_v4 = vpack.c.bf16 %v43_v3, %v42_v2  ;;  %v216_v7 = vpack.c.bf16 %v45_v6, %v44_v5  ;;  %v46_v8 = vld [vmem:[#allocation5 + $0x20] sm:$0xff]  ;;  %v47_v9 = vld [vmem:[#allocation5 + $0x28] sm:$0xff]  ;;  %v48_v11 = vld [vmem:[#allocation5 + $0x30] sm:$0xff]  ;;  %s148_s12 = sshll.u32 %s327_s11, 4  ;;  %s149_s12 = int_to_ptr.vmem [resolvable:$true] %s148_s12 }
  0x29   :  { %v219_v10 = vpack.c.bf16 %v47_v9, %v46_v8  ;;  %v49_v12 = vld [vmem:[#allocation5 + $0x38] sm:$0xff]  ;;  %v50_v14 = vld [vmem:[#allocation5 + $0x40] sm:$0xff]  ;;  %v51_v15 = vld [vmem:[#allocation5 + $0x48] sm:$0xff]  ;;  %s292_s13 = scalar_lea.vmem %s149_s12, 128  ;;  %p297_p3 = scmp.lt.s32.totalorder %s149_s12, %s149_s12 }
  0x2a   :  { %214 = vmatpush3.bf16.xpose.msra.mxu0 %v213_v4  ;;  %v222_v13 = vpack.c.bf16 %v49_v12, %v48_v11  ;;  %v225_v16 = vpack.c.bf16 %v51_v15, %v50_v14  ;;  %v52_v17 = vld [vmem:[#allocation5 + $0x50] sm:$0xff]  ;;  %v53_v18 = vld [vmem:[#allocation5 + $0x58] sm:$0xff]  ;;  %v54_v20 = vld [vmem:[#allocation5 + $0x60] sm:$0xff]  ;;  %p293_p2 = scmp.ne.s32.totalorder %s149_s12, %s292_s13  ;;  %p298_p4 = scmp.lt.s32.totalorder %s292_s13, %s292_s13 }
  0x2b   :  { %215 = vmatprep.subr.bf16.mxu0 %v324_v0  ;;  %v228_v19 = vpack.c.bf16 %v53_v18, %v52_v17  ;;  %v55_v21 = vld [vmem:[#allocation5 + $0x68] sm:$0xff]  ;;  %v56_v23 = vld [vmem:[#allocation5 + $0x70] sm:$0xff]  ;;  %v57_v24 = vld [vmem:[#allocation5 + $0x78] sm:$0xff] }
  0x2c   :  { %v231_v22 = vpack.c.bf16 %v55_v21, %v54_v20  ;;  %v234_v25 = vpack.c.bf16 %v57_v24, %v56_v23  ;;  %v41_v26 = vld [vmem:[#allocation2] sm:$0xff]  ;;  %p299_p5 = por %p298_p4, %p297_p3 }
  0x2d   :  { %v158_v27 = vld [vmem:[%s396_s2] ss:$0 sm:$0xff] }
  0x2e   :  { %p300_p6 = pnand %p299_p5, %p293_p2 }
  0x32   :  { %217 = vmatpush3.bf16.xpose.msra.mxu0 %v216_v7 }
  0x33   :  { %218 = vmatprep.subr.bf16.mxu0 %v324_v0 }
  0x3a   :  { %220 = vmatpush3.bf16.xpose.msra.mxu0 %v219_v10 }
  0x3b   :  { %221 = vmatprep.subr.bf16.mxu0 %v324_v0 }
  0x42   :  { %223 = vmatpush3.bf16.xpose.msra.mxu0 %v222_v13 }
  0x43   :  { %224 = vmatprep.subr.bf16.mxu0 %v324_v0 }
  0x4a   :  { %226 = vmatpush3.bf16.xpose.msra.mxu0 %v225_v16 }
  0x4b   :  { %227 = vmatprep.subr.bf16.mxu0 %v324_v0 }
  0x52   :  { %229 = vmatpush3.bf16.xpose.msra.mxu0 %v228_v19 }
  0x53   :  { %230 = vmatprep.subr.bf16.mxu0 %v324_v0 }
  0x5a   :  { %232 = vmatpush3.bf16.xpose.msra.mxu0 %v231_v22 }
  0x5b   :  { %233 = vmatprep.subr.bf16.mxu0 %v324_v0 }
  0x62   :  { %235 = vmatpush3.bf16.xpose.msra.mxu0 %v234_v25 }
  0x69   :  { %210 = vmatmul.mubr.f32.vlgmr.msra.gmra.mrb[0].mxu0 %v41_v26 }
 0x13c   :  { %v131_v28 = vpop.f32.mrb[0].mxu0 }
 0x13d   :  { %v132_v29 = vadd.f32 %v158_v27, %v131_v28  ;;  %v211_v30 = vpop.f32.mrb[1].mxu0 }
 0x13f   :  { %v159_v31 = vmul.f32 -1.442695, %v132_v29 }
 0x141   :  { %244 = vpow2.f32 %v159_v31 }
 0x14b   :  { %v245_v32 = vpop.eup %244 }
 0x14c   :  { %v138_v33 = vadd.f32 1.0, %v245_v32 }
 0x14e   :  { %246 = vrcp.f32 %v138_v33 }
 0x158   :  { %v247_v34 = vpop.eup %246 }
 0x159   :  { %141 = vst [vmem:[#allocation7] sm:$0xff] %v247_v34 }
 0x15a   :  { %303 = shalt.err (!%p300_p6)
}
 0x15b   :  { %s304_s15 = scalar_lea.hbm %s397_s3, 128 }
 0x15c   :  { %p305_p7 = scmp.ne.s32.totalorder %s397_s3, %s304_s15  ;;  %p308_p8 = scmp.lt.u32.totalorder %s304_s15, %s397_s3 }
 0x15e   :  { %p310_p9 = pnand %p308_p8, %p305_p7 }
 0x160   :  { %313 = shalt.err (!%p310_p9)
}
 0x161   :  { %151 = dma.vmem_to_hbm [thread:$0]  %s149_s12, 128, %s397_s3, [#allocation4]  }
 0x162   :  { %318 = dma.done.wait [#allocation4], 128  }
 0x163   :  { %319 = vsyncadd [#allocation4], 4294967168 }
 0x164   :  { %155 = vsyncpa [#allocation3], 1 }
 0x165   :  { %156 = vsyncpa [#allocation6], 1 }
 0x166   :  { %157 = vsyncpa [#allocation4], 1 }

</bundles_post_ra>
